<compile_context>
chip_gen: v5e
topology: v5e:2x2
jax: 0.10.0
libtpu: 0.0.40
codegen_flags: <defaults>
</compile_context>

<pallas_src>
import math
import jax
import jax.numpy as jnp
from jax.experimental import pallas as pl
from jax.experimental.pallas import tpu as pltpu

LANE = 128
SUBLANE = 8


def _round_up(x, m):
    return ((x + m - 1) // m) * m


def _pad2(a, rows, cols):
    return jnp.pad(a, ((0, rows - a.shape[0]), (0, cols - a.shape[1])))


def _make_kernel(n_hidden):
    """Builds a fused MLP-encoder kernel for `n_hidden` (Linear+ReLU) layers.

    Ref layout: x, (w_i, b_i) * n_hidden, w_head, b_head, out
    """

    def kernel(*refs):
        x_ref = refs[0]
        out_ref = refs[-1]
        h = x_ref[...]
        idx = 1
        for _ in range(n_hidden):
            w_ref, b_ref = refs[idx], refs[idx + 1]
            idx += 2
            h = jnp.dot(h, w_ref[...], preferred_element_type=jnp.float32) + b_ref[...]
            h = jnp.maximum(h, 0.0)

        # Dropout(0.5): eval-mode => identity.
        # TODO(synk): training-mode dropout (Bernoulli mask via pltpu.prng_*) not applied.

        # Fused output heads: single matmul, single lane-dense output slab.
        wh_ref, bh_ref = refs[idx], refs[idx + 1]
        out_ref[...] = (jnp.dot(h, wh_ref[...], preferred_element_type=jnp.float32)
                        + bh_ref[...]).astype(out_ref.dtype)

    return kernel


def encoder_forward(x, params, *, batch_tile=512):
    """Fused Pallas encoder forward.

    params: dict with w1,b1,...,wN,bN (hidden layers, weights (in,out), biases (1,out))
            and wm,bm,wv,bv (heads).
    Returns (mean, logvar), each (batch, latent_dim).
    """
    batch, input_dim = x.shape
    n_hidden = sum(1 for k in params if k.startswith("w") and k[1:].isdigit())
    latent_dim = params["wm"].shape[1]
    dtype = x.dtype

    # ---- Fuse the two heads into one (hidden, 2*latent) matmul ----
    wh = jnp.concatenate([params["wm"], params["wv"]], axis=1)   # (hid, 2*latent)
    bh = jnp.concatenate([params["bm"], params["bv"]], axis=1)   # (1,   2*latent)

    # ---- Lane-dense padding of every feature dimension ----
    d_in_p = _round_up(input_dim, LANE)
    hid_dims = [params[f"w{i+1}"].shape[1] for i in range(n_hidden)]
    hid_p = [_round_up(h, LANE) for h in hid_dims]
    d_out = 2 * latent_dim
    d_out_p = _round_up(d_out, LANE)

    # ---- Batch tiling: >= 8 sublanes; tile up to `batch_tile` rows ----
    batch_p = _round_up(batch, SUBLANE)
    if batch_p <= batch_tile:
        tb = batch_p
    else:
        tb = batch_tile
        batch_p = _round_up(batch_p, tb)
    grid = (batch_p // tb,)

    # ---- Pad operands (zero padding preserves semantics exactly) ----
    x_p = _pad2(x, batch_p, d_in_p)
    operands = [x_p]
    in_dims = [d_in_p] + hid_p
    for i in range(n_hidden):
        operands.append(_pad2(params[f"w{i+1}"], in_dims[i], in_dims[i + 1]))
        operands.append(_pad2(params[f"b{i+1}"], 1, in_dims[i + 1]))
    operands.append(_pad2(wh, hid_p[-1], d_out_p))
    operands.append(_pad2(bh, 1, d_out_p))

    # ---- BlockSpecs: x/out tiled over batch, weights resident (block (0,0)) ----
    in_specs = [pl.BlockSpec((tb, d_in_p), lambda i: (i, 0))]
    for op in operands[1:]:
        in_specs.append(pl.BlockSpec(op.shape, lambda i: (0, 0)))
    out_specs = pl.BlockSpec((tb, d_out_p), lambda i: (i, 0))
    out_shape = jax.ShapeDtypeStruct((batch_p, d_out_p), dtype)

    # ---- Advisory cost estimate for XLA scheduling ----
    dims_chain = [d_in_p] + hid_p + [d_out_p]
    flops = 2 * batch_p * sum(dims_chain[i] * dims_chain[i + 1]
                              for i in range(len(dims_chain) - 1))
    bytes_accessed = (sum(int(op.size) for op in operands)
                      + batch_p * d_out_p) * x_p.dtype.itemsize
    cost = pl.CostEstimate(flops=flops, transcendentals=0,
                           bytes_accessed=bytes_accessed)

    out = pl.pallas_call(
        _make_kernel(n_hidden),
        out_shape=out_shape,
        grid=grid,
        in_specs=in_specs,
        out_specs=out_specs,
        compiler_params=pltpu.CompilerParams(dimension_semantics=("parallel",)),
        cost_estimate=cost,
    )(*operands)

    # Slice padded batch / padded head columns back off.
    mean = out[:batch, :latent_dim]
    logvar = out[:batch, latent_dim:2 * latent_dim]
    return mean, logvar


def init_params(key, input_dim, hidden_dims, latent_dim, dtype=jnp.float32):
    """Deterministic init mimicking PyTorch nn.Linear default U(-1/sqrt(fan_in), +)."""
    params = {}
    dims = [input_dim] + list(hidden_dims)
    keys = jax.random.split(key, 2 * (len(hidden_dims) + 2))
    k_it = iter(keys)

    def linear(kw, kb, fan_in, fan_out):
        bound = 1.0 / math.sqrt(fan_in)
        w = jax.random.uniform(kw, (fan_in, fan_out), dtype, -bound, bound)
        b = jax.random.uniform(kb, (1, fan_out), dtype, -bound, bound)
        return w, b

    for i in range(len(hidden_dims)):
        w, b = linear(next(k_it), next(k_it), dims[i], dims[i + 1])
        params[f"w{i+1}"] = w
        params[f"b{i+1}"] = b

    params["wm"], params["bm"] = linear(next(k_it), next(k_it), hidden_dims[-1], latent_dim)
    params["wv"], params["bv"] = linear(next(k_it), next(k_it), hidden_dims[-1], latent_dim)
    return params


def encoder_reference(x, params):
    """Pure-JAX reference for correctness check."""
    n_hidden = sum(1 for k in params if k.startswith("w") and k[1:].isdigit())
    h = x
    for i in range(1, n_hidden + 1):
        h = jnp.maximum(h @ params[f"w{i}"] + params[f"b{i}"], 0.0)
    mean = h @ params["wm"] + params["bm"]
    logvar = h @ params["wv"] + params["bv"]
    return mean, logvar


if __name__ == "__main__":
    key = jax.random.PRNGKey(0)
    k_x, k_p, k_x2 = jax.random.split(key, 3)

    # Small shapes consistent with the module's forward.
    batch = 2
    input_dim = 8
    hidden_dims = [32, 32, 32]
    latent_dim = 4

    x = jax.random.normal(k_x, (batch, input_dim), dtype=jnp.float32)
    params = init_params(k_p, input_dim, hidden_dims, latent_dim)

    mean, logvar = encoder_forward(x, params)
    mean, logvar = jax.block_until_ready((mean, logvar))

    ref_mean, ref_logvar = encoder_reference(x, params)
    assert mean.shape == (batch, latent_dim) and logvar.shape == (batch, latent_dim)
    assert jnp.allclose(mean, ref_mean, atol=1e-5, rtol=1e-5)
    assert jnp.allclose(logvar, ref_logvar, atol=1e-5, rtol=1e-5)

    # Exercise the multi-tile grid path (batch tiled + padded) cheaply.
    batch2 = 20
    x2 = jax.random.normal(k_x2, (batch2, input_dim), dtype=jnp.float32)
    mean2, logvar2 = encoder_forward(x2, params, batch_tile=8)
    mean2, logvar2 = jax.block_until_ready((mean2, logvar2))
    ref_mean2, ref_logvar2 = encoder_reference(x2, params)
    assert mean2.shape == (batch2, latent_dim) and logvar2.shape == (batch2, latent_dim)
    assert jnp.allclose(mean2, ref_mean2, atol=1e-5, rtol=1e-5)
    assert jnp.allclose(logvar2, ref_logvar2, atol=1e-5, rtol=1e-5)

    print("KERNEL_OK")
</pallas_src>

<mosaic_0001>
module attributes {stable_mosaic.version = 11 : i64} {
  func.func @kernel(%arg0: i32, %arg1: memref<8x128xf32, #tpu.memory_space<vmem>>, %arg2: memref<128x128xf32, #tpu.memory_space<vmem>>, %arg3: memref<1x128xf32, #tpu.memory_space<vmem>>, %arg4: memref<128x128xf32, #tpu.memory_space<vmem>>, %arg5: memref<1x128xf32, #tpu.memory_space<vmem>>, %arg6: memref<128x128xf32, #tpu.memory_space<vmem>>, %arg7: memref<1x128xf32, #tpu.memory_space<vmem>>, %arg8: memref<128x128xf32, #tpu.memory_space<vmem>>, %arg9: memref<1x128xf32, #tpu.memory_space<vmem>>, %arg10: memref<8x128xf32, #tpu.memory_space<vmem>>) attributes {dimension_semantics = [#tpu.dimension_semantics<parallel>], iteration_bounds = array<i64: 1>, scalar_prefetch = 0 : i64, scratch_operands = 0 : i64, tpu.core_type = #tpu.core_type<tc>, window_params = [{transform_indices = @transform_0, window_bounds = array<i64: 8, 128>}, {pipeline_mode = #tpu.pipeline_mode<synchronous>, transform_indices = @transform_1, window_bounds = array<i64: 128, 128>}, {pipeline_mode = #tpu.pipeline_mode<synchronous>, transform_indices = @transform_2, window_bounds = array<i64: 1, 128>}, {pipeline_mode = #tpu.pipeline_mode<synchronous>, transform_indices = @transform_3, window_bounds = array<i64: 128, 128>}, {pipeline_mode = #tpu.pipeline_mode<synchronous>, transform_indices = @transform_4, window_bounds = array<i64: 1, 128>}, {pipeline_mode = #tpu.pipeline_mode<synchronous>, transform_indices = @transform_5, window_bounds = array<i64: 128, 128>}, {pipeline_mode = #tpu.pipeline_mode<synchronous>, transform_indices = @transform_6, window_bounds = array<i64: 1, 128>}, {pipeline_mode = #tpu.pipeline_mode<synchronous>, transform_indices = @transform_7, window_bounds = array<i64: 128, 128>}, {pipeline_mode = #tpu.pipeline_mode<synchronous>, transform_indices = @transform_8, window_bounds = array<i64: 1, 128>}, {transform_indices = @transform_9, window_bounds = array<i64: 8, 128>}]} {
    %c0 = arith.constant 0 : index
    %c0_0 = arith.constant 0 : index
    %0 = vector.load %arg1[%c0, %c0_0] : memref<8x128xf32, #tpu.memory_space<vmem>>, vector<8x128xf32>
    %c0_1 = arith.constant 0 : index
    %c0_2 = arith.constant 0 : index
    %1 = vector.load %arg2[%c0_1, %c0_2] : memref<128x128xf32, #tpu.memory_space<vmem>>, vector<128x128xf32>
    %cst = arith.constant dense<0.000000e+00> : vector<8x128xf32>
    %2 = tpu.matmul %0, %1, %cst {dimension_numbers = #tpu.dot_dimension_numbers<[1], [0], [0], [1], [0, 0, 1, 1], [], []>} : vector<8x128xf32>, vector<128x128xf32>, vector<8x128xf32> -> vector<8x128xf32>
    %c0_3 = arith.constant 0 : index
    %c0_4 = arith.constant 0 : index
    %3 = vector.load %arg3[%c0_3, %c0_4] : memref<1x128xf32, #tpu.memory_space<vmem>>, vector<1x128xf32>
    %4 = vector.broadcast %3 : vector<1x128xf32> to vector<8x128xf32>
    %5 = arith.addf %2, %4 : vector<8x128xf32>
    %cst_5 = arith.constant 0.000000e+00 : f32
    %6 = vector.broadcast %cst_5 : f32 to vector<8x128xf32>
    %7 = arith.maximumf %5, %6 : vector<8x128xf32>
    %c0_6 = arith.constant 0 : index
    %c0_7 = arith.constant 0 : index
    %8 = vector.load %arg4[%c0_6, %c0_7] : memref<128x128xf32, #tpu.memory_space<vmem>>, vector<128x128xf32>
    %cst_8 = arith.constant dense<0.000000e+00> : vector<8x128xf32>
    %9 = tpu.matmul %7, %8, %cst_8 {dimension_numbers = #tpu.dot_dimension_numbers<[1], [0], [0], [1], [0, 0, 1, 1], [], []>} : vector<8x128xf32>, vector<128x128xf32>, vector<8x128xf32> -> vector<8x128xf32>
    %c0_9 = arith.constant 0 : index
    %c0_10 = arith.constant 0 : index
    %10 = vector.load %arg5[%c0_9, %c0_10] : memref<1x128xf32, #tpu.memory_space<vmem>>, vector<1x128xf32>
    %11 = vector.broadcast %10 : vector<1x128xf32> to vector<8x128xf32>
    %12 = arith.addf %9, %11 : vector<8x128xf32>
    %cst_11 = arith.constant 0.000000e+00 : f32
    %13 = vector.broadcast %cst_11 : f32 to vector<8x128xf32>
    %14 = arith.maximumf %12, %13 : vector<8x128xf32>
    %c0_12 = arith.constant 0 : index
    %c0_13 = arith.constant 0 : index
    %15 = vector.load %arg6[%c0_12, %c0_13] : memref<128x128xf32, #tpu.memory_space<vmem>>, vector<128x128xf32>
    %cst_14 = arith.constant dense<0.000000e+00> : vector<8x128xf32>
    %16 = tpu.matmul %14, %15, %cst_14 {dimension_numbers = #tpu.dot_dimension_numbers<[1], [0], [0], [1], [0, 0, 1, 1], [], []>} : vector<8x128xf32>, vector<128x128xf32>, vector<8x128xf32> -> vector<8x128xf32>
    %c0_15 = arith.constant 0 : index
    %c0_16 = arith.constant 0 : index
    %17 = vector.load %arg7[%c0_15, %c0_16] : memref<1x128xf32, #tpu.memory_space<vmem>>, vector<1x128xf32>
    %18 = vector.broadcast %17 : vector<1x128xf32> to vector<8x128xf32>
    %19 = arith.addf %16, %18 : vector<8x128xf32>
    %cst_17 = arith.constant 0.000000e+00 : f32
    %20 = vector.broadcast %cst_17 : f32 to vector<8x128xf32>
    %21 = arith.maximumf %19, %20 : vector<8x128xf32>
    %c0_18 = arith.constant 0 : index
    %c0_19 = arith.constant 0 : index
    %22 = vector.load %arg8[%c0_18, %c0_19] : memref<128x128xf32, #tpu.memory_space<vmem>>, vector<128x128xf32>
    %cst_20 = arith.constant dense<0.000000e+00> : vector<8x128xf32>
    %23 = tpu.matmul %21, %22, %cst_20 {dimension_numbers = #tpu.dot_dimension_numbers<[1], [0], [0], [1], [0, 0, 1, 1], [], []>} : vector<8x128xf32>, vector<128x128xf32>, vector<8x128xf32> -> vector<8x128xf32>
    %c0_21 = arith.constant 0 : index
    %c0_22 = arith.constant 0 : index
    %24 = vector.load %arg9[%c0_21, %c0_22] : memref<1x128xf32, #tpu.memory_space<vmem>>, vector<1x128xf32>
    %25 = vector.broadcast %24 : vector<1x128xf32> to vector<8x128xf32>
    %26 = arith.addf %23, %25 : vector<8x128xf32>
    %c0_23 = arith.constant 0 : index
    %c0_24 = arith.constant 0 : index
    %27 = vector.load %arg10[%c0_23, %c0_24] : memref<8x128xf32, #tpu.memory_space<vmem>>, vector<8x128xf32>
    tpu.vector_store %arg10[%c0_23, %c0_24], %26 {strides = array<i32>} : memref<8x128xf32, #tpu.memory_space<vmem>>, vector<8x128xf32>,
    return
  }
  func.func @transform_0(%arg0: i32) -> (i32, i32) {
    %c0_i32 = arith.constant 0 : i32
    %c0_i32_0 = arith.constant 0 : i32
    return %arg0, %c0_i32 : i32, i32
  }
  func.func @transform_1(%arg0: i32) -> (i32, i32) {
    %c0_i32 = arith.constant 0 : i32
    %c0_i32_0 = arith.constant 0 : i32
    %c0_i32_1 = arith.constant 0 : i32
    return %c0_i32, %c0_i32_0 : i32, i32
  }
  func.func @transform_2(%arg0: i32) -> (i32, i32) {
    %c0_i32 = arith.constant 0 : i32
    %c0_i32_0 = arith.constant 0 : i32
    %c0_i32_1 = arith.constant 0 : i32
    return %c0_i32, %c0_i32_0 : i32, i32
  }
  func.func @transform_3(%arg0: i32) -> (i32, i32) {
    %c0_i32 = arith.constant 0 : i32
    %c0_i32_0 = arith.constant 0 : i32
    %c0_i32_1 = arith.constant 0 : i32
    return %c0_i32, %c0_i32_0 : i32, i32
  }
  func.func @transform_4(%arg0: i32) -> (i32, i32) {
    %c0_i32 = arith.constant 0 : i32
    %c0_i32_0 = arith.constant 0 : i32
    %c0_i32_1 = arith.constant 0 : i32
    return %c0_i32, %c0_i32_0 : i32, i32
  }
  func.func @transform_5(%arg0: i32) -> (i32, i32) {
    %c0_i32 = arith.constant 0 : i32
    %c0_i32_0 = arith.constant 0 : i32
    %c0_i32_1 = arith.constant 0 : i32
    return %c0_i32, %c0_i32_0 : i32, i32
  }
  func.func @transform_6(%arg0: i32) -> (i32, i32) {
    %c0_i32 = arith.constant 0 : i32
    %c0_i32_0 = arith.constant 0 : i32
    %c0_i32_1 = arith.constant 0 : i32
    return %c0_i32, %c0_i32_0 : i32, i32
  }
  func.func @transform_7(%arg0: i32) -> (i32, i32) {
    %c0_i32 = arith.constant 0 : i32
    %c0_i32_0 = arith.constant 0 : i32
    %c0_i32_1 = arith.constant 0 : i32
    return %c0_i32, %c0_i32_0 : i32, i32
  }
  func.func @transform_8(%arg0: i32) -> (i32, i32) {
    %c0_i32 = arith.constant 0 : i32
    %c0_i32_0 = arith.constant 0 : i32
    %c0_i32_1 = arith.constant 0 : i32
    return %c0_i32, %c0_i32_0 : i32, i32
  }
  func.func @transform_9(%arg0: i32) -> (i32, i32) {
    %c0_i32 = arith.constant 0 : i32
    %c0_i32_0 = arith.constant 0 : i32
    return %arg0, %c0_i32 : i32, i32
  }
}

</mosaic_0001>

<bundles_post_ra>
// kernel: tpu_custom_call.1
= control target key start
LH: loop header
LB: loop body
LE: loop exit
PB: predicated region body
PF: predicated region fallthrough
CT: control target
= control target key end

     0   :  { %14 = vsyncpa [#allocation3], 0  ;;  %s545_s0 = inlined_call_operand.hbm [shape: f32[8,128], index: 0, kind: input, shape index: {}]   ;;  %s546_s1 = inlined_call_operand.hbm [shape: f32[128,128], index: 1, kind: input, shape index: {}]   ;;  %s547_s2 = inlined_call_operand.vmem [shape: f32[1,128], index: 2, kind: input, shape index: {}]   ;;  %s548_s3 = inlined_call_operand.hbm [shape: f32[128,128], index: 3, kind: input, shape index: {}]   ;;  %s549_s4 = inlined_call_operand.vmem [shape: f32[1,128], index: 4, kind: input, shape index: {}]   ;;  %s550_s5 = inlined_call_operand.hbm [shape: f32[128,128], index: 5, kind: input, shape index: {}]   ;;  %s551_s6 = inlined_call_operand.vmem [shape: f32[1,128], index: 6, kind: input, shape index: {}]   ;;  %s552_s7 = inlined_call_operand.hbm [shape: f32[128,128], index: 7, kind: input, shape index: {}]   ;;  %s553_s8 = inlined_call_operand.vmem [shape: f32[1,128], index: 8, kind: input, shape index: {}]   ;;  %s554_s9 = inlined_call_operand.hbm [shape: f32[8,128], index: 9, kind: output, shape index: {}]  }
   0x1   :  { %15 = vsyncpa [#allocation6], 0 }
   0x2   :  { %16 = vsyncpa [#allocation9], 0  ;;  %s33_s11 = sshll.u32 %s546_s1, 4  ;;  %s34_s11 = int_to_ptr.hbm [resolvable:$true] %s33_s11 }
   0x3   :  { %17 = vsyncpa [#allocation4], 0  ;;  %s457_s12 = smov [#allocation5]   ;;  %s63_s16 = sshll.u32 %s550_s5, 4  ;;  %s64_s16 = int_to_ptr.hbm [resolvable:$true] %s63_s16 }
   0x4   :  { %s35_s13 = sshll.u32 %s457_s12, 4  ;;  %s458_s17 = smov 128   ;;  %s36_s13 = int_to_ptr.vmem [resolvable:$true] %s35_s13 }
   0x5   :  { %s459_s18 = smov 8   ;;  %s460_s19 = smov [#allocation8]  }
   0x6   :  { %41 = dma.hbm_to_vmem [thread:$0]  %s34_s11, 2048, %s36_s13, [#allocation6], %s458_s17, %s458_s17, %s459_s18  }
   0x7   :  { %s65_s20 = sshll.u32 %s460_s19, 4  ;;  %s23_s23 = sshll.u32 %s545_s0, 4  ;;  %s66_s20 = int_to_ptr.vmem [resolvable:$true] %s65_s20  ;;  %s24_s23 = int_to_ptr.hbm [resolvable:$true] %s23_s23 }
   0x8   :  { %71 = dma.hbm_to_vmem [thread:$0]  %s64_s16, 2048, %s66_s20, [#allocation9], %s458_s17, %s458_s17, %s459_s18  }
   0x9   :  { %s48_s25 = sshll.u32 %s548_s3, 4  ;;  %s461_s26 = smov [#allocation2]   ;;  %s49_s25 = int_to_ptr.hbm [resolvable:$true] %s48_s25 }
   0xa   :  { %s25_s27 = sshll.u32 %s461_s26, 4  ;;  %s462_s5 = smov [#allocation7]   ;;  %s26_s27 = int_to_ptr.vmem [resolvable:$true] %s25_s27 }
   0xb   :  { %28 = dma.hbm_to_vmem [thread:$0]  %s24_s23, 128, %s26_s27, [#allocation3]  }
   0xc   :  { %s50_s28 = sshll.u32 %s462_s5, 4  ;;  %s78_s10 = sshll.u32 %s552_s7, 4  ;;  %s51_s28 = int_to_ptr.vmem [resolvable:$true] %s50_s28  ;;  %s79_s10 = int_to_ptr.hbm [resolvable:$true] %s78_s10 }
   0xd   :  { %56 = dma.hbm_to_vmem [thread:$0]  %s49_s25, 2048, %s51_s28, [#allocation6], %s458_s17, %s458_s17, %s459_s18  }
   0xe   :  { %s463_s0 = smov [#allocation10]  }
   0xf   :  { %s80_s11 = sshll.u32 %s463_s0, 4  ;;  %s81_s11 = int_to_ptr.vmem [resolvable:$true] %s80_s11 }
  0x10   :  { %86 = dma.hbm_to_vmem [thread:$0]  %s79_s10, 2048, %s81_s11, [#allocation9], %s458_s17, %s458_s17, %s459_s18  }
  0x11   :  { %449 = dma.done.wait [#allocation3], 128  }
  0x12   :  { %450 = vsyncadd [#allocation3], 4294967168 }
  0x13   :  { %451 = dma.done.wait [#allocation6], 4096  }
  0x14   :  { %452 = vsyncadd [#allocation6], 4294963200 }
  0x15   :  { %453 = dma.done.wait [#allocation9], 4096  }
  0x16   :  { %454 = vsyncadd [#allocation9], 4294963200  ;;  %v125_v0 = vld [vmem:[#allocation5 + $0x78] sm:$0xff]  ;;  %v124_v1 = vld [vmem:[#allocation5 + $0x70] sm:$0xff]  ;;  %s464_s16 = smov [#allocation11]   ;;  %s281_s20 = sshll.u32 %s554_s9, 4  ;;  %s282_s20 = int_to_ptr.hbm [resolvable:$true] %s281_s20 }
  0x17   :  { %130 = vmatpush.msra.mxu0 %v125_v0  ;;  %v123_v2 = vld [vmem:[#allocation5 + $0x68] sm:$0xff]  ;;  %v122_v3 = vld [vmem:[#allocation5 + $0x60] sm:$0xff]  ;;  %v166_v4 = vld [vmem:[#allocation7 + $0x78] sm:$0xff]  ;;  %s279_s17 = sshll.u32 %s464_s16, 4  ;;  %s280_s17 = int_to_ptr.vmem [resolvable:$true] %s279_s17 }
  0x18   :  { %v121_v5 = vld [vmem:[#allocation5 + $0x58] sm:$0xff]  ;;  %171 = vmatpush.msra.mxu1 %v166_v4  ;;  %v165_v6 = vld [vmem:[#allocation7 + $0x70] sm:$0xff]  ;;  %v164_v7 = vld [vmem:[#allocation7 + $0x68] sm:$0xff] }
  0x19   :  { %131 = vmatpush.msra.mxu0 %v124_v1  ;;  %v120_v8 = vld [vmem:[#allocation5 + $0x50] sm:$0xff]  ;;  %v163_v9 = vld [vmem:[#allocation7 + $0x60] sm:$0xff]  ;;  %v119_v10 = vld [vmem:[#allocation5 + $0x48] sm:$0xff] }
  0x1a   :  { %172 = vmatpush.msra.mxu1 %v165_v6  ;;  %v162_v11 = vld [vmem:[#allocation7 + $0x58] sm:$0xff]  ;;  %v118_v12 = vld [vmem:[#allocation5 + $0x40] sm:$0xff]  ;;  %v161_v13 = vld [vmem:[#allocation7 + $0x50] sm:$0xff] }
  0x1b   :  { %132 = vmatpush.msra.mxu0 %v123_v2  ;;  %v117_v14 = vld [vmem:[#allocation5 + $0x38] sm:$0xff]  ;;  %v160_v15 = vld [vmem:[#allocation7 + $0x48] sm:$0xff]  ;;  %v116_v16 = vld [vmem:[#allocation5 + $0x30] sm:$0xff] }
  0x1c   :  { %173 = vmatpush.msra.mxu1 %v164_v7  ;;  %v159_v17 = vld [vmem:[#allocation7 + $0x40] sm:$0xff]  ;;  %v115_v18 = vld [vmem:[#allocation5 + $0x28] sm:$0xff]  ;;  %v158_v19 = vld [vmem:[#allocation7 + $0x38] sm:$0xff] }
  0x1d   :  { %133 = vmatpush.msra.mxu0 %v122_v3  ;;  %v114_v20 = vld [vmem:[#allocation5 + $0x20] sm:$0xff]  ;;  %v157_v21 = vld [vmem:[#allocation7 + $0x30] sm:$0xff]  ;;  %v113_v22 = vld [vmem:[#allocation5 + $0x18] sm:$0xff] }
  0x1e   :  { %174 = vmatpush.msra.mxu1 %v163_v9  ;;  %v156_v23 = vld [vmem:[#allocation7 + $0x28] sm:$0xff]  ;;  %v112_v24 = vld [vmem:[#allocation5 + $0x10] sm:$0xff]  ;;  %v155_v25 = vld [vmem:[#allocation7 + $0x20] sm:$0xff] }
  0x1f   :  { %134 = vmatpush.msra.mxu0 %v121_v5  ;;  %v111_v26 = vld [vmem:[#allocation5 + $0x8] sm:$0xff]  ;;  %v154_v27 = vld [vmem:[#allocation7 + $0x18] sm:$0xff]  ;;  %v110_v28 = vld [vmem:[#allocation5] sm:$0xff] }
  0x20   :  { %175 = vmatpush.msra.mxu1 %v162_v11  ;;  %v109_v29 = vld [vmem:[#allocation2] sm:$0xff]  ;;  %v153_v30 = vld [vmem:[#allocation7 + $0x10] sm:$0xff]  ;;  %v152_v31 = vld [vmem:[#allocation7 + $0x8] sm:$0xff] }
  0x21   :  { %135 = vmatpush.msra.mxu0 %v120_v8  ;;  %v151_v32 = vld [vmem:[#allocation7] sm:$0xff]  ;;  %v207_v33 = vld [vmem:[#allocation8 + $0x78] sm:$0xff]  ;;  %v206_v34 = vld [vmem:[#allocation8 + $0x70] sm:$0xff] }
  0x22   :  { %176 = vmatpush.msra.mxu1 %v161_v13  ;;  %212 = vmatpush.msra.mxu2 %v207_v33  ;;  %v205_v35 = vld [vmem:[#allocation8 + $0x68] sm:$0xff]  ;;  %v204_v36 = vld [vmem:[#allocation8 + $0x60] sm:$0xff]  ;;  %v203_v37 = vld [vmem:[#allocation8 + $0x58] sm:$0xff] }
  0x23   :  { %136 = vmatpush.msra.mxu0 %v119_v10  ;;  %v202_v38 = vld [vmem:[#allocation8 + $0x50] sm:$0xff]  ;;  %v201_v39 = vld [vmem:[#allocation8 + $0x48] sm:$0xff]  ;;  %v200_v40 = vld [vmem:[#allocation8 + $0x40] sm:$0xff] }
  0x24   :  { %177 = vmatpush.msra.mxu1 %v160_v15  ;;  %213 = vmatpush.msra.mxu2 %v206_v34  ;;  %v199_v41 = vld [vmem:[#allocation8 + $0x38] sm:$0xff]  ;;  %v198_v42 = vld [vmem:[#allocation8 + $0x30] sm:$0xff]  ;;  %v197_v43 = vld [vmem:[#allocation8 + $0x28] sm:$0xff] }
  0x25   :  { %137 = vmatpush.msra.mxu0 %v118_v12  ;;  %v196_v44 = vld [vmem:[#allocation8 + $0x20] sm:$0xff]  ;;  %v195_v45 = vld [vmem:[#allocation8 + $0x18] sm:$0xff]  ;;  %v194_v50 = vld [vmem:[#allocation8 + $0x10] sm:$0xff] }
  0x26   :  { %178 = vmatpush.msra.mxu1 %v159_v17  ;;  %214 = vmatpush.msra.mxu2 %v205_v35  ;;  %v301_v46 = vld [vmem:[%s547_s2] ss:$0 sm:$0xff]  ;;  %v193_v51 = vld [vmem:[#allocation8 + $0x8] sm:$0xff]  ;;  %v192_v52 = vld [vmem:[#allocation8] sm:$0xff] }
  0x27   :  { %138 = vmatpush.msra.mxu0 %v117_v14  ;;  %v248_v53 = vld [vmem:[#allocation10 + $0x78] sm:$0xff]  ;;  %v247_v54 = vld [vmem:[#allocation10 + $0x70] sm:$0xff]  ;;  %v246_v55 = vld [vmem:[#allocation10 + $0x68] sm:$0xff] }
  0x28   :  { %179 = vmatpush.msra.mxu1 %v158_v19  ;;  %215 = vmatpush.msra.mxu2 %v204_v36  ;;  %v245_v56 = vld [vmem:[#allocation10 + $0x60] sm:$0xff]  ;;  %v244_v57 = vld [vmem:[#allocation10 + $0x58] sm:$0xff]  ;;  %v243_v58 = vld [vmem:[#allocation10 + $0x50] sm:$0xff] }
  0x29   :  { %139 = vmatpush.msra.mxu0 %v116_v16  ;;  %253 = vmatpush.msra.mxu3 %v248_v53  ;;  %v242_v59 = vld [vmem:[#allocation10 + $0x48] sm:$0xff]  ;;  %v241_v60 = vld [vmem:[#allocation10 + $0x40] sm:$0xff]  ;;  %v240_v61 = vld [vmem:[#allocation10 + $0x38] sm:$0xff] }
  0x2a   :  { %180 = vmatpush.msra.mxu1 %v157_v21  ;;  %216 = vmatpush.msra.mxu2 %v203_v37  ;;  %v239_v62 = vld [vmem:[#allocation10 + $0x30] sm:$0xff]  ;;  %v238_v63 = vld [vmem:[#allocation10 + $0x28] sm:$0xff]  ;;  %v237_v0 = vld [vmem:[#allocation10 + $0x20] sm:$0xff] }
  0x2b   :  { %140 = vmatpush.msra.mxu0 %v115_v18  ;;  %254 = vmatpush.msra.mxu3 %v247_v54  ;;  %v236_v1 = vld [vmem:[#allocation10 + $0x18] sm:$0xff]  ;;  %v235_v6 = vld [vmem:[#allocation10 + $0x10] sm:$0xff]  ;;  %v234_v7 = vld [vmem:[#allocation10 + $0x8] sm:$0xff] }
  0x2c   :  { %181 = vmatpush.msra.mxu1 %v156_v23  ;;  %217 = vmatpush.msra.mxu2 %v202_v38  ;;  %v302_v2 = vld [vmem:[%s549_s4] ss:$0 sm:$0xff]  ;;  %v233_v8 = vld [vmem:[#allocation10] sm:$0xff] }
  0x2d   :  { %141 = vmatpush.msra.mxu0 %v114_v20  ;;  %255 = vmatpush.msra.mxu3 %v246_v55  ;;  %v303_v9 = vld [vmem:[%s551_s6] ss:$0 sm:$0xff] }
  0x2e   :  { %182 = vmatpush.msra.mxu1 %v155_v25  ;;  %218 = vmatpush.msra.mxu2 %v201_v39  ;;  %v304_v13 = vld [vmem:[%s553_s8] ss:$0 sm:$0xff] }
  0x2f   :  { %142 = vmatpush.msra.mxu0 %v113_v22  ;;  %256 = vmatpush.msra.mxu3 %v245_v56 }
  0x30   :  { %183 = vmatpush.msra.mxu1 %v154_v27  ;;  %219 = vmatpush.msra.mxu2 %v200_v40 }
  0x31   :  { %143 = vmatpush.msra.mxu0 %v112_v24  ;;  %257 = vmatpush.msra.mxu3 %v244_v57 }
  0x32   :  { %184 = vmatpush.msra.mxu1 %v153_v30  ;;  %220 = vmatpush.msra.mxu2 %v199_v41 }
  0x33   :  { %144 = vmatpush.msra.mxu0 %v111_v26  ;;  %258 = vmatpush.msra.mxu3 %v243_v58 }
  0x34   :  { %185 = vmatpush.msra.mxu1 %v152_v31  ;;  %221 = vmatpush.msra.mxu2 %v198_v42 }
  0x35   :  { %145 = vmatpush.msra.mxu0 %v110_v28  ;;  %259 = vmatpush.msra.mxu3 %v242_v59 }
  0x36   :  { %146 = vmatmul.f32.vlgmr.msra.gmra.mxu0 %v109_v29  ;;  %186 = vmatpush.msra.mxu1 %v151_v32 }
  0x37   :  { %222 = vmatpush.msra.mxu2 %v197_v43  ;;  %260 = vmatpush.msra.mxu3 %v241_v60 }
  0x39   :  { %223 = vmatpush.msra.mxu2 %v196_v44  ;;  %261 = vmatpush.msra.mxu3 %v240_v61 }
  0x3b   :  { %224 = vmatpush.msra.mxu2 %v195_v45  ;;  %262 = vmatpush.msra.mxu3 %v239_v62 }
  0x3d   :  { %225 = vmatpush.msra.mxu2 %v194_v50  ;;  %263 = vmatpush.msra.mxu3 %v238_v63 }
  0x3f   :  { %226 = vmatpush.msra.mxu2 %v193_v51  ;;  %264 = vmatpush.msra.mxu3 %v237_v0 }
  0x41   :  { %227 = vmatpush.msra.mxu2 %v192_v52  ;;  %265 = vmatpush.msra.mxu3 %v236_v1 }
  0x43   :  { %266 = vmatpush.msra.mxu3 %v235_v6 }
  0x45   :  { %267 = vmatpush.msra.mxu3 %v234_v7 }
  0x47   :  { %268 = vmatpush.msra.mxu3 %v233_v8 }
  0xb3   :  { %v147_v47 = vpop.f32.mrf.mxu0 }
  0xb4   :  { %v148_v48 = vadd.f32 %v301_v46, %v147_v47 }
  0xb6   :  { %v150_v49 = vmax.f32 %v148_v48, 0.0 }
  0xb8   :  { %187 = vmatmul.f32.vlgmr.msra.gmra.mxu1 %v150_v49 }
 0x135   :  { %v188_v3 = vpop.f32.mrf.mxu1 }
 0x136   :  { %v189_v4 = vadd.f32 %v302_v2, %v188_v3 }
 0x138   :  { %v191_v5 = vmax.f32 %v189_v4, 0.0 }
 0x13a   :  { %228 = vmatmul.f32.vlgmr.msra.gmra.mxu2 %v191_v5 }
 0x1bd   :  { %v229_v10 = vpop.f32.mrf.mxu2 }
 0x1be   :  { %v230_v11 = vadd.f32 %v303_v9, %v229_v10 }
 0x1c0   :  { %v232_v12 = vmax.f32 %v230_v11, 0.0 }
 0x1c2   :  { %269 = vmatmul.f32.vlgmr.msra.gmra.mxu3 %v232_v12 }
 0x245   :  { %v270_v14 = vpop.f32.mrf.mxu3 }
 0x246   :  { %v271_v15 = vadd.f32 %v304_v13, %v270_v14 }
 0x248   :  { %273 = vst [vmem:[#allocation11] sm:$0xff] %v271_v15 }
 0x249   :  { %284 = dma.vmem_to_hbm [thread:$0]  %s280_s17, 128, %s282_s20, [#allocation4]  }
 0x24a   :  { %455 = dma.done.wait [#allocation4], 128  }
 0x24b   :  { %456 = vsyncadd [#allocation4], 4294967168 }
 0x24c   :  { %289 = vsyncpa [#allocation3], 1 }
 0x24d   :  { %290 = vsyncpa [#allocation6], 1 }
 0x24e   :  { %291 = vsyncpa [#allocation9], 1 }
 0x24f   :  { %292 = vsyncpa [#allocation4], 1 }

</bundles_post_ra>
